<compile_context>
chip_gen: v7x
topology: tpu7x:2x2x1
jax: 0.10.0
libtpu: 0.0.40
codegen_flags: <defaults>
</compile_context>

<pallas_src>
import functools

import jax
import jax.numpy as jnp
from jax.experimental import pallas as pl
from jax.experimental.pallas import tpu as pltpu

EPS = 1e-5
LANE = 128
SUBLANE = 8


def _round_up(n, m):
    return ((n + m - 1) // m) * m


def _mlp_kernel(num_layers, x_ref, w0_ref, *rest):
    # rest = ([wh_ref if num_layers > 1], gb_ref, wout_ref, bout_ref, o_ref)
    if num_layers > 1:
        wh_ref = rest[0]
        rest = rest[1:]
    gb_ref, wout_ref, bout_ref, o_ref = rest

    x = x_ref[...].astype(jnp.float32)  # [B, 1]

    def bn_relu(h, i):
        # One-pass batch stats + fused affine. Hidden-layer Linear bias is omitted:
        # it cancels exactly against the batch-mean subtraction below.
        mu = jnp.mean(h, axis=0, keepdims=True)            # [1, Hp]  (XLU sublane reduce)
        msq = jnp.mean(h * h, axis=0, keepdims=True)       # [1, Hp]
        var = msq - mu * mu
        gamma = gb_ref[2 * i:2 * i + 1, :]
        beta = gb_ref[2 * i + 1:2 * i + 2, :]
        scale = gamma * jax.lax.rsqrt(var + EPS)            # EUP rsqrt (free slot)
        shift = beta - mu * scale
        return jnp.maximum(h * scale + shift, 0.0)          # 2 VPU ops/elem + ReLU

    # Layer 0: [B,1] @ [1,Hp] is a K=1 contraction -> VPU outer product, not MXU.
    h = x * w0_ref[...]                                      # [B, Hp]
    h = bn_relu(h, 0)

    # Hidden -> hidden layers: [Hp, Hp] MXU matmuls, f32 accumulate, no bias.
    for i in range(1, num_layers):
        h = jnp.dot(h, wh_ref[i - 1], preferred_element_type=jnp.float32)
        h = bn_relu(h, i)

    # Final Linear: output dim padded to 128 lanes -> full-lane (unmasked) store;
    # the real result lives in column 0 and is sliced outside the kernel.
    o_ref[...] = (
        jnp.dot(h, wout_ref[...], preferred_element_type=jnp.float32) + bout_ref[...]
    )


def mlp_forward(x, packed_params, num_layers):
    """x: [B, 1] float32, B a multiple of 8 (sublane-full batch).
    packed_params: lane-padded, stacked kernel params from pack_params()."""
    B = x.shape[0]
    assert B % SUBLANE == 0, "batch must be a multiple of 8 (BN stats over full sublanes)"
    kernel = functools.partial(_mlp_kernel, num_layers)
    vmem = pl.BlockSpec(memory_space=pltpu.MemorySpace.VMEM)
    out_pad = pl.pallas_call(
        kernel,
        out_shape=jax.ShapeDtypeStruct((B, LANE), jnp.float32),
        in_specs=[vmem] * (1 + len(packed_params)),
        out_specs=vmem,
    )(x, *packed_params)
    return out_pad[:, :1]


def init_params(key, num_layers, num_hidden):
    """PyTorch-like init. Returns per-layer (w, b, gamma, beta) and (w_out, b_out)."""
    layer_params = []
    dims = [1] + [num_hidden] * num_layers
    for i in range(num_layers):
        fan_in = dims[i]
        key, k_w, k_b = jax.random.split(key, 3)
        bound = 1.0 / float(fan_in) ** 0.5
        w = jax.random.uniform(k_w, (fan_in, num_hidden), jnp.float32, -bound, bound)
        b = jax.random.uniform(k_b, (1, num_hidden), jnp.float32, -bound, bound)
        gamma = jnp.ones((1, num_hidden), jnp.float32)   # BN weight
        beta = jnp.zeros((1, num_hidden), jnp.float32)   # BN bias
        layer_params.append((w, b, gamma, beta))
    key, k_w, k_b = jax.random.split(key, 3)
    bound = 1.0 / float(num_hidden) ** 0.5
    w_out = jax.random.uniform(k_w, (num_hidden, 1), jnp.float32, -bound, bound)
    b_out = jax.random.uniform(k_b, (1, 1), jnp.float32, -bound, bound)
    return layer_params, (w_out, b_out)


def pack_params(layer_params, out_params, num_layers, num_hidden):
    """Zero-pad feature dims to 128 lanes and stack per-layer params.

    Hidden-layer Linear biases are intentionally NOT packed (they cancel against
    BN's batch-mean subtraction). Padding is exact: padded weight columns and
    gamma/beta are zero, so padded features stay exactly zero through BN/ReLU.
    """
    H = num_hidden
    Hp = _round_up(num_hidden, LANE)

    w0 = jnp.zeros((1, Hp), jnp.float32).at[:, :H].set(layer_params[0][0])

    # gamma/beta interleaved: row 2i = gamma_i, row 2i+1 = beta_i  -> one operand.
    gb = jnp.zeros((2 * num_layers, Hp), jnp.float32)
    for i, (_, _, g, be) in enumerate(layer_params):
        gb = gb.at[2 * i, :H].set(g[0])
        gb = gb.at[2 * i + 1, :H].set(be[0])

    packed = [w0]
    if num_layers > 1:
        wh = jnp.zeros((num_layers - 1, Hp, Hp), jnp.float32)
        for i in range(1, num_layers):
            wh = wh.at[i - 1, :H, :H].set(layer_params[i][0])
        packed.append(wh)

    w_out, b_out = out_params
    wout = jnp.zeros((Hp, LANE), jnp.float32).at[:H, :1].set(w_out)
    bout = jnp.zeros((1, LANE), jnp.float32).at[:, :1].set(b_out)
    packed += [gb, wout, bout]
    return packed


def reference_forward(x, layer_params, out_params):
    """Pure-JAX reference mirroring the PyTorch module exactly (biases included,
    two-pass BN) — verifies the kernel's algebraic simplifications are exact."""
    h = x
    for (w, b, g, be) in layer_params:
        h = h @ w + b
        mu = jnp.mean(h, axis=0, keepdims=True)
        var = jnp.mean((h - mu) ** 2, axis=0, keepdims=True)
        h = g * (h - mu) * jax.lax.rsqrt(var + EPS) + be
        h = jnp.maximum(h, 0.0)
    w_out, b_out = out_params
    return h @ w_out + b_out


if __name__ == "__main__":
    num_layers = 2
    num_hidden = 32
    batch = 8

    key = jax.random.PRNGKey(0)
    key, k_x = jax.random.split(key)
    x = jax.random.normal(k_x, (batch, 1), jnp.float32)

    layer_params, out_params = init_params(key, num_layers, num_hidden)
    packed = pack_params(layer_params, out_params, num_layers, num_hidden)

    out = mlp_forward(x, packed, num_layers)
    out = jax.block_until_ready(out)

    ref = reference_forward(x, layer_params, out_params)
    assert out.shape == (batch, 1)
    assert jnp.allclose(out, ref, atol=1e-4, rtol=1e-4), (out, ref)

    print("KERNEL_OK")
</pallas_src>

<mosaic_0001>
module attributes {stable_mosaic.version = 11 : i64} {
  func.func @_mlp_kernel(%arg0: memref<8x1xf32, #tpu.memory_space<vmem>>, %arg1: memref<1x128xf32, #tpu.memory_space<vmem>>, %arg2: memref<1x128x128xf32, #tpu.memory_space<vmem>>, %arg3: memref<4x128xf32, #tpu.memory_space<vmem>>, %arg4: memref<128x128xf32, #tpu.memory_space<vmem>>, %arg5: memref<1x128xf32, #tpu.memory_space<vmem>>, %arg6: memref<8x128xf32, #tpu.memory_space<vmem>>) attributes {dimension_semantics = [], scalar_prefetch = 0 : i64, scratch_operands = 0 : i64, tpu.core_type = #tpu.core_type<tc>} {
    %c0 = arith.constant 0 : index
    %c0_0 = arith.constant 0 : index
    %0 = vector.load %arg0[%c0, %c0_0] : memref<8x1xf32, #tpu.memory_space<vmem>>, vector<8x1xf32>
    %c0_1 = arith.constant 0 : index
    %c0_2 = arith.constant 0 : index
    %1 = vector.load %arg1[%c0_1, %c0_2] : memref<1x128xf32, #tpu.memory_space<vmem>>, vector<1x128xf32>
    %2 = vector.broadcast %0 : vector<8x1xf32> to vector<8x128xf32>
    %3 = vector.broadcast %1 : vector<1x128xf32> to vector<8x128xf32>
    %4 = arith.mulf %2, %3 : vector<8x128xf32>
    %cst = arith.constant dense<0.000000e+00> : vector<128xf32>
    %5 = vector.multi_reduction <add>, %4, %cst [0] : vector<8x128xf32> to vector<128xf32>
    %6 = vector.shape_cast %5 : vector<128xf32> to vector<1x128xf32>
    %cst_3 = arith.constant 8.000000e+00 : f32
    %7 = vector.broadcast %cst_3 : f32 to vector<1x128xf32>
    %8 = arith.divf %6, %7 : vector<1x128xf32>
    %9 = arith.mulf %4, %4 : vector<8x128xf32>
    %cst_4 = arith.constant dense<0.000000e+00> : vector<128xf32>
    %10 = vector.multi_reduction <add>, %9, %cst_4 [0] : vector<8x128xf32> to vector<128xf32>
    %11 = vector.shape_cast %10 : vector<128xf32> to vector<1x128xf32>
    %cst_5 = arith.constant 8.000000e+00 : f32
    %12 = vector.broadcast %cst_5 : f32 to vector<1x128xf32>
    %13 = arith.divf %11, %12 : vector<1x128xf32>
    %14 = arith.mulf %8, %8 : vector<1x128xf32>
    %15 = arith.subf %13, %14 : vector<1x128xf32>
    %c0_6 = arith.constant 0 : index
    %c0_7 = arith.constant 0 : index
    %16 = vector.load %arg3[%c0_6, %c0_7] : memref<4x128xf32, #tpu.memory_space<vmem>>, vector<1x128xf32>
    %c1 = arith.constant 1 : index
    %c0_8 = arith.constant 0 : index
    %17 = vector.load %arg3[%c1, %c0_8] : memref<4x128xf32, #tpu.memory_space<vmem>>, vector<1x128xf32>
    %cst_9 = arith.constant 9.99999974E-6 : f32
    %18 = vector.broadcast %cst_9 : f32 to vector<1x128xf32>
    %19 = arith.addf %15, %18 : vector<1x128xf32>
    %20 = math.rsqrt %19 : vector<1x128xf32>
    %21 = arith.mulf %16, %20 : vector<1x128xf32>
    %22 = arith.mulf %8, %21 : vector<1x128xf32>
    %23 = arith.subf %17, %22 : vector<1x128xf32>
    %24 = vector.broadcast %21 : vector<1x128xf32> to vector<8x128xf32>
    %25 = arith.mulf %4, %24 : vector<8x128xf32>
    %26 = vector.broadcast %23 : vector<1x128xf32> to vector<8x128xf32>
    %27 = arith.addf %25, %26 : vector<8x128xf32>
    %cst_10 = arith.constant 0.000000e+00 : f32
    %28 = vector.broadcast %cst_10 : f32 to vector<8x128xf32>
    %29 = arith.maximumf %27, %28 : vector<8x128xf32>
    %c0_11 = arith.constant 0 : index
    %c0_12 = arith.constant 0 : index
    %c0_13 = arith.constant 0 : index
    %30 = vector.load %arg2[%c0_11, %c0_12, %c0_13] : memref<1x128x128xf32, #tpu.memory_space<vmem>>, vector<1x128x128xf32>
    %31 = vector.shape_cast %30 : vector<1x128x128xf32> to vector<128x128xf32>
    %cst_14 = arith.constant dense<0.000000e+00> : vector<8x128xf32>
    %32 = tpu.matmul %29, %31, %cst_14 {dimension_numbers = #tpu.dot_dimension_numbers<[1], [0], [0], [1], [0, 0, 1, 1], [], []>} : vector<8x128xf32>, vector<128x128xf32>, vector<8x128xf32> -> vector<8x128xf32>
    %cst_15 = arith.constant dense<0.000000e+00> : vector<128xf32>
    %33 = vector.multi_reduction <add>, %32, %cst_15 [0] : vector<8x128xf32> to vector<128xf32>
    %34 = vector.shape_cast %33 : vector<128xf32> to vector<1x128xf32>
    %cst_16 = arith.constant 8.000000e+00 : f32
    %35 = vector.broadcast %cst_16 : f32 to vector<1x128xf32>
    %36 = arith.divf %34, %35 : vector<1x128xf32>
    %37 = arith.mulf %32, %32 : vector<8x128xf32>
    %cst_17 = arith.constant dense<0.000000e+00> : vector<128xf32>
    %38 = vector.multi_reduction <add>, %37, %cst_17 [0] : vector<8x128xf32> to vector<128xf32>
    %39 = vector.shape_cast %38 : vector<128xf32> to vector<1x128xf32>
    %cst_18 = arith.constant 8.000000e+00 : f32
    %40 = vector.broadcast %cst_18 : f32 to vector<1x128xf32>
    %41 = arith.divf %39, %40 : vector<1x128xf32>
    %42 = arith.mulf %36, %36 : vector<1x128xf32>
    %43 = arith.subf %41, %42 : vector<1x128xf32>
    %c2 = arith.constant 2 : index
    %c0_19 = arith.constant 0 : index
    %44 = vector.load %arg3[%c2, %c0_19] : memref<4x128xf32, #tpu.memory_space<vmem>>, vector<1x128xf32>
    %c3 = arith.constant 3 : index
    %c0_20 = arith.constant 0 : index
    %45 = vector.load %arg3[%c3, %c0_20] : memref<4x128xf32, #tpu.memory_space<vmem>>, vector<1x128xf32>
    %cst_21 = arith.constant 9.99999974E-6 : f32
    %46 = vector.broadcast %cst_21 : f32 to vector<1x128xf32>
    %47 = arith.addf %43, %46 : vector<1x128xf32>
    %48 = math.rsqrt %47 : vector<1x128xf32>
    %49 = arith.mulf %44, %48 : vector<1x128xf32>
    %50 = arith.mulf %36, %49 : vector<1x128xf32>
    %51 = arith.subf %45, %50 : vector<1x128xf32>
    %52 = vector.broadcast %49 : vector<1x128xf32> to vector<8x128xf32>
    %53 = arith.mulf %32, %52 : vector<8x128xf32>
    %54 = vector.broadcast %51 : vector<1x128xf32> to vector<8x128xf32>
    %55 = arith.addf %53, %54 : vector<8x128xf32>
    %cst_22 = arith.constant 0.000000e+00 : f32
    %56 = vector.broadcast %cst_22 : f32 to vector<8x128xf32>
    %57 = arith.maximumf %55, %56 : vector<8x128xf32>
    %c0_23 = arith.constant 0 : index
    %c0_24 = arith.constant 0 : index
    %58 = vector.load %arg4[%c0_23, %c0_24] : memref<128x128xf32, #tpu.memory_space<vmem>>, vector<128x128xf32>
    %cst_25 = arith.constant dense<0.000000e+00> : vector<8x128xf32>
    %59 = tpu.matmul %57, %58, %cst_25 {dimension_numbers = #tpu.dot_dimension_numbers<[1], [0], [0], [1], [0, 0, 1, 1], [], []>} : vector<8x128xf32>, vector<128x128xf32>, vector<8x128xf32> -> vector<8x128xf32>
    %c0_26 = arith.constant 0 : index
    %c0_27 = arith.constant 0 : index
    %60 = vector.load %arg5[%c0_26, %c0_27] : memref<1x128xf32, #tpu.memory_space<vmem>>, vector<1x128xf32>
    %61 = vector.broadcast %60 : vector<1x128xf32> to vector<8x128xf32>
    %62 = arith.addf %59, %61 : vector<8x128xf32>
    %c0_28 = arith.constant 0 : index
    %c0_29 = arith.constant 0 : index
    %63 = vector.load %arg6[%c0_28, %c0_29] : memref<8x128xf32, #tpu.memory_space<vmem>>, vector<8x128xf32>
    tpu.vector_store %arg6[%c0_28, %c0_29], %62 {strides = array<i32>} : memref<8x128xf32, #tpu.memory_space<vmem>>, vector<8x128xf32>,
    return
  }
}

</mosaic_0001>

<bundles_post_ra>
// kernel: tpu_custom_call.1
= control target key start
LH: loop header
LB: loop body
LE: loop exit
PB: predicated region body
PF: predicated region fallthrough
CT: control target
= control target key end

     0   :  { %11 = vsyncpa [#allocation3], 0  ;;  %s696_s0 = inlined_call_operand.vmem [shape: f32[8,1], index: 0, kind: input, shape index: {}]   ;;  %s697_s1 = inlined_call_operand.vmem [shape: f32[1,128], index: 1, kind: input, shape index: {}]   ;;  %s698_s2 = inlined_call_operand.hbm [shape: f32[1,128,128], index: 2, kind: input, shape index: {}]   ;;  %s699_s3 = inlined_call_operand.vmem [shape: f32[4,128], index: 3, kind: input, shape index: {}]   ;;  %s700_s4 = inlined_call_operand.hbm [shape: f32[128,128], index: 4, kind: input, shape index: {}]   ;;  %s701_s5 = inlined_call_operand.vmem [shape: f32[1,128], index: 5, kind: input, shape index: {}]   ;;  %s702_s6 = inlined_call_operand.hbm [shape: f32[8,128], index: 6, kind: output, shape index: {}]  }
   0x1   :  { %12 = vsyncpa [#allocation6], 0 }
   0x2   :  { %13 = vsyncpa [#allocation4], 0  ;;  %s573_s21 = smov [#allocation2]   ;;  %s501_s25 = scalar_lea.hbm %s698_s2, 2048 }
   0x3   :  { %s23_s22 = sshll.u32 %s573_s21, 4  ;;  %p502_p0 = scmp.ne.s32.totalorder %s698_s2, %s501_s25  ;;  %s24_s22 = int_to_ptr.vmem [resolvable:$true] %s23_s22 }
   0x4   :  { %p505_p1 = scmp.lt.u32.totalorder %s501_s25, %s698_s2 }
   0x6   :  { %p507_p2 = pnand %p505_p1, %p502_p0 }
   0x8   :  { %510 = shalt.err (!%p507_p2)
}
   0x9   :  { %s511_s30 = scalar_lea.vmem %s24_s22, 2048  ;;  %p516_p4 = scmp.lt.s32.totalorder %s24_s22, %s24_s22 }
   0xa   :  { %p512_p3 = scmp.ne.s32.totalorder %s24_s22, %s511_s30  ;;  %p517_p5 = scmp.lt.s32.totalorder %s511_s30, %s511_s30 }
   0xc   :  { %p518_p6 = por %p517_p5, %p516_p4 }
   0xe   :  { %p519_p7 = pnand %p518_p6, %p512_p3 }
  0x10   :  { %522 = shalt.err (!%p519_p7)
}
  0x11   :  { %s574_s7 = smov 128   ;;  %s575_s8 = smov 8  }
  0x12   :  { %29 = dma.hbm_to_vmem [thread:$0]  %s698_s2, 2048, %s24_s22, [#allocation3], %s574_s7, %s574_s7, %s575_s8  }
  0x13   :  { %s576_s11 = smov [#allocation5]   ;;  %s523_s15 = scalar_lea.hbm %s700_s4, 2048 }
  0x14   :  { %s37_s12 = sshll.u32 %s576_s11, 4  ;;  %p524_p8 = scmp.ne.s32.totalorder %s700_s4, %s523_s15  ;;  %s38_s12 = int_to_ptr.vmem [resolvable:$true] %s37_s12 }
  0x15   :  { %p527_p9 = scmp.lt.u32.totalorder %s523_s15, %s700_s4 }
  0x17   :  { %p529_p10 = pnand %p527_p9, %p524_p8 }
  0x19   :  { %532 = shalt.err (!%p529_p10)
}
  0x1a   :  { %s533_s20 = scalar_lea.vmem %s38_s12, 2048  ;;  %p538_p12 = scmp.lt.s32.totalorder %s38_s12, %s38_s12 }
  0x1b   :  { %p534_p11 = scmp.ne.s32.totalorder %s38_s12, %s533_s20  ;;  %p539_p13 = scmp.lt.s32.totalorder %s533_s20, %s533_s20 }
  0x1d   :  { %p540_p0 = por %p539_p13, %p538_p12 }
  0x1f   :  { %p541_p1 = pnand %p540_p0, %p534_p11 }
  0x21   :  { %544 = shalt.err (!%p541_p1)
}
  0x22   :  { %43 = dma.hbm_to_vmem [thread:$0]  %s700_s4, 2048, %s38_s12, [#allocation6], %s574_s7, %s574_s7, %s575_s8  }
  0x23   :  { %567 = dma.done.wait [#allocation3], 2048  }
  0x24   :  { %568 = vsyncadd [#allocation3], 4294965248 }
  0x25   :  { %569 = dma.done.wait [#allocation6], 2048  }
  0x26   :  { %570 = vsyncadd [#allocation6], 4294965248  ;;  %v577_v0 = vmov 0   ;;  %v52_v1 = vld [vmem:[%s696_s0] sm:$0xff]  ;;  %v103_v3 = vld [vmem:[#allocation2 + $0x8] sm:$0xff]  ;;  %v578_v5 = vmov 0.0|0.0   ;;  %v91_v49 = vlaneseq }
  0x27   :  { %496 = vset.pattern.permute.xlu0 %v577_v0  ;;  %v102_v2 = vld [vmem:[#allocation2] sm:$0xff]  ;;  %439 = vmatprep.subr.bf16.mxu0 %v578_v5  ;;  %v104_v6 = vld [vmem:[#allocation2 + $0x10] sm:$0xff]  ;;  %v105_v7 = vld [vmem:[#allocation2 + $0x18] sm:$0xff]  ;;  %vm579_vm0 = vmmov 0   ;;  %v580_v11 = vmov 0.0   ;;  %s581_s9 = smov [#allocation7]  }
  0x28   :  { %56 = vperm.xlu0 %496, %v52_v1   ;;  %v440_v4 = vpack.c.bf16 %v103_v3, %v102_v2  ;;  %463 = vmatprep.subr.bf16.mxu1 %v578_v5  ;;  %v443_v8 = vpack.c.bf16 %v105_v7, %v104_v6  ;;  %v106_v9 = vld [vmem:[#allocation2 + $0x20] sm:$0xff]  ;;  %v107_v10 = vld [vmem:[#allocation2 + $0x28] sm:$0xff]  ;;  %v108_v13 = vld [vmem:[#allocation2 + $0x30] sm:$0xff]  ;;  %v92_v50 = vshrl.u32 %v91_v49, 7  ;;  %s323_s10 = sshll.u32 %s581_s9, 4  ;;  %s324_s10 = int_to_ptr.vmem [resolvable:$true] %s323_s10 }
  0x29   :  { %401 = vmatprep.mubr.msk.f32.mxu0 %vm579_vm0, %v580_v11  ;;  %436 = vmatprep.mubr.msk.f32.mxu1 %vm579_vm0, %v580_v11  ;;  %v446_v12 = vpack.c.bf16 %v107_v10, %v106_v9  ;;  %v109_v14 = vld [vmem:[#allocation2 + $0x38] sm:$0xff]  ;;  %v110_v16 = vld [vmem:[#allocation2 + $0x40] sm:$0xff]  ;;  %v111_v17 = vld [vmem:[#allocation2 + $0x48] sm:$0xff]  ;;  %p550_p3 = scmp.lt.s32.totalorder %s324_s10, %s324_s10 }
  0x2a   :  { %441 = vmatpush3.bf16.msra.mxu0 %v440_v4  ;;  %v449_v15 = vpack.c.bf16 %v109_v14, %v108_v13  ;;  %v452_v18 = vpack.c.bf16 %v111_v17, %v110_v16  ;;  %v112_v19 = vld [vmem:[#allocation2 + $0x50] sm:$0xff]  ;;  %v113_v20 = vld [vmem:[#allocation2 + $0x58] sm:$0xff]  ;;  %v114_v22 = vld [vmem:[#allocation2 + $0x60] sm:$0xff]  ;;  %v659_v52 = vsub.s32 0, %v92_v50 }
  0x2b   :  { %442 = vmatprep.subr.bf16.mxu0 %v578_v5  ;;  %v455_v21 = vpack.c.bf16 %v113_v20, %v112_v19  ;;  %v115_v23 = vld [vmem:[#allocation2 + $0x68] sm:$0xff]  ;;  %v116_v25 = vld [vmem:[#allocation2 + $0x70] sm:$0xff]  ;;  %v117_v26 = vld [vmem:[#allocation2 + $0x78] sm:$0xff] }
  0x2c   :  { %v458_v24 = vpack.c.bf16 %v115_v23, %v114_v22  ;;  %v461_v27 = vpack.c.bf16 %v117_v26, %v116_v25  ;;  %v333_v28 = vld [vmem:[%s697_s1] ss:$0 sm:$0xff]  ;;  %v85_v55 = vld [vmem:[%s699_s3 + $0x1] sm:$0x1]  ;;  %v224_v0 = vld [vmem:[#allocation5 + $0x8] sm:$0xff] }
  0x2d   :  { %v84_v51 = vld [vmem:[%s699_s3] sm:$0x1]  ;;  %v225_v2 = vld [vmem:[#allocation5 + $0x10] sm:$0xff]  ;;  %v226_v3 = vld [vmem:[#allocation5 + $0x18] sm:$0xff] }
  0x2e   :  { %444 = vmatpush3.bf16.msra.mxu0 %v443_v8  ;;  %v223_v63 = vld [vmem:[#allocation5] sm:$0xff]  ;;  %v467_v4 = vpack.c.bf16 %v226_v3, %v225_v2  ;;  %v228_v7 = vld [vmem:[#allocation5 + $0x28] sm:$0xff]  ;;  %v229_v9 = vld [vmem:[#allocation5 + $0x30] sm:$0xff] }
  0x2f   :  { %445 = vmatprep.subr.bf16.mxu0 %v578_v5  ;;  %v464_v1 = vpack.c.bf16 %v224_v0, %v223_v63  ;;  %v227_v6 = vld [vmem:[#allocation5 + $0x20] sm:$0xff]  ;;  %v230_v10 = vld [vmem:[#allocation5 + $0x38] sm:$0xff]  ;;  %v232_v13 = vld [vmem:[#allocation5 + $0x48] sm:$0xff] }
  0x30   :  { %v470_v8 = vpack.c.bf16 %v228_v7, %v227_v6  ;;  %v473_v11 = vpack.c.bf16 %v230_v10, %v229_v9  ;;  %v234_v16 = vld [vmem:[#allocation5 + $0x58] sm:$0xff]  ;;  %v236_v19 = vld [vmem:[#allocation5 + $0x68] sm:$0xff] }
  0x31   :  { %465 = vmatpush3.bf16.msra.mxu1 %v464_v1  ;;  %v238_v22 = vld [vmem:[#allocation5 + $0x78] sm:$0xff] }
  0x32   :  { %447 = vmatpush3.bf16.msra.mxu0 %v446_v12  ;;  %466 = vmatprep.subr.bf16.mxu1 %v578_v5  ;;  %v231_v12 = vld [vmem:[#allocation5 + $0x40] sm:$0xff] }
  0x33   :  { %448 = vmatprep.subr.bf16.mxu0 %v578_v5  ;;  %v476_v14 = vpack.c.bf16 %v232_v13, %v231_v12 }
  0x35   :  { %468 = vmatpush3.bf16.msra.mxu1 %v467_v4 }
  0x36   :  { %450 = vmatpush3.bf16.msra.mxu0 %v449_v15  ;;  %469 = vmatprep.subr.bf16.mxu1 %v578_v5  ;;  %v233_v15 = vld [vmem:[#allocation5 + $0x50] sm:$0xff] }
  0x37   :  { %451 = vmatprep.subr.bf16.mxu0 %v578_v5  ;;  %v479_v17 = vpack.c.bf16 %v234_v16, %v233_v15 }
  0x39   :  { %471 = vmatpush3.bf16.msra.mxu1 %v470_v8 }
  0x3a   :  { %453 = vmatpush3.bf16.msra.mxu0 %v452_v18  ;;  %472 = vmatprep.subr.bf16.mxu1 %v578_v5  ;;  %v235_v18 = vld [vmem:[#allocation5 + $0x60] sm:$0xff] }
  0x3b   :  { %454 = vmatprep.subr.bf16.mxu0 %v578_v5  ;;  %v482_v20 = vpack.c.bf16 %v236_v19, %v235_v18 }
  0x3d   :  { %474 = vmatpush3.bf16.msra.mxu1 %v473_v11 }
  0x3e   :  { %456 = vmatpush3.bf16.msra.mxu0 %v455_v21  ;;  %475 = vmatprep.subr.bf16.mxu1 %v578_v5  ;;  %v237_v21 = vld [vmem:[#allocation5 + $0x70] sm:$0xff] }
  0x3f   :  { %457 = vmatprep.subr.bf16.mxu0 %v578_v5  ;;  %v485_v23 = vpack.c.bf16 %v238_v22, %v237_v21 }
  0x41   :  { %477 = vmatpush3.bf16.msra.mxu1 %v476_v14 }
  0x42   :  { %459 = vmatpush3.bf16.msra.mxu0 %v458_v24  ;;  %478 = vmatprep.subr.bf16.mxu1 %v578_v5 }
  0x43   :  { %460 = vmatprep.subr.bf16.mxu0 %v578_v5 }
  0x45   :  { %480 = vmatpush3.bf16.msra.mxu1 %v479_v17 }
  0x46   :  { %462 = vmatpush3.bf16.msra.mxu0 %v461_v27  ;;  %481 = vmatprep.subr.bf16.mxu1 %v578_v5 }
  0x49   :  { %483 = vmatpush3.bf16.msra.mxu1 %v482_v20 }
  0x4a   :  { %484 = vmatprep.subr.bf16.mxu1 %v578_v5 }
  0x4d   :  { %486 = vmatpush3.bf16.msra.mxu1 %v485_v23 }
  0xa7   :  { %v57_v29 = vpop.permute.xlu0 %56 }
  0xa8   :  { %v65_v30 = vmul.f32 %v333_v28, %v57_v29 }
  0xaa   :  { %v66_v31 = vrot.slane %v65_v30, 4  ;;  %v74_v32 = vmul.f32 %v65_v30, %v65_v30 }
  0xac   :  { %v67_v33 = vadd.f32 %v66_v31, %v65_v30  ;;  %v75_v34 = vrot.slane %v74_v32, 4 }
  0xae   :  { %v68_v35 = vrot.slane %v67_v33, 2  ;;  %v76_v36 = vadd.f32 %v75_v34, %v74_v32 }
  0xb0   :  { %v69_v37 = vadd.f32 %v68_v35, %v67_v33  ;;  %v77_v38 = vrot.slane %v76_v36, 2 }
  0xb2   :  { %v70_v39 = vrot.slane %v69_v37, 1  ;;  %v78_v40 = vadd.f32 %v77_v38, %v76_v36 }
  0xb4   :  { %v71_v41 = vadd.f32 %v70_v39, %v69_v37  ;;  %v79_v42 = vrot.slane %v78_v40, 1 }
  0xb6   :  { %v80_v43 = vadd.f32 %v79_v42, %v78_v40  ;;  %v73_v44 = vmul.f32 0.125, %v71_v41 }
  0xb8   :  { %v81_v45 = vmul.f32 0.125, %v80_v43  ;;  %v82_v46 = vmul.f32 %v73_v44, %v73_v44  ;;  %v205_v43 = vld [vmem:[%s699_s3 + $0x2] sm:$0x1] }
  0xba   :  { %v83_v47 = vsub.f32 %v81_v45, %v82_v46  ;;  %v206_v46 = vld [vmem:[%s699_s3 + $0x3] sm:$0x1]  ;;  %s545_s3 = scalar_lea.vmem %s324_s10, 128 }
  0xbb   :  { %p546_p2 = scmp.ne.s32.totalorder %s324_s10, %s545_s3  ;;  %p551_p4 = scmp.lt.s32.totalorder %s545_s3, %s545_s3 }
  0xbc   :  { %v86_v48 = vadd.f32 1e-05, %v83_v47 }
  0xbd   :  { %p552_p5 = por %p551_p4, %p550_p3 }
  0xbe   :  { %497 = vrsqrt.f32 %v86_v48 }
  0xbf   :  { %p553_p6 = pnand %p552_p5, %p546_p2 }
  0xc8   :  { %v498_v53 = vpop.eup %497 }
  0xc9   :  { %v88_v54 = vmul.f32 %v498_v53, %v84_v51 }
  0xcb   :  { %v89_v56 = vmul.f32 %v88_v54, %v73_v44  ;;  %v94_v57 = vrot.slane %v88_v54, %v659_v52 }
  0xcd   :  { %v90_v58 = vsub.f32 %v85_v55, %v89_v56  ;;  %v95_v59 = vmul.f32 %v94_v57, %v65_v30  ;;  %v334_v55 = vld [vmem:[%s701_s5] ss:$0 sm:$0xff] }
  0xcf   :  { %v99_v60 = vrot.slane %v90_v58, %v659_v52 }
  0xd1   :  { %v100_v61 = vadd.f32 %v99_v60, %v95_v59 }
  0xd3   :  { %v101_v62 = vmax.f32 %v100_v61, 0.0 }
  0xd5   :  { %402 = vmatmul.mubr.f32.vlgmr.msra.gmra.mrb[0].mxu0 %v101_v62 }
 0x1a8   :  { %v184_v24 = vpop.f32.mrb[0].mxu0 }
 0x1a9   :  { %v188_v25 = vrot.slane %v184_v24, 4  ;;  %v195_v26 = vmul.f32 %v184_v24, %v184_v24  ;;  %v403_v27 = vpop.f32.mrb[1].mxu0 }
 0x1ab   :  { %v189_v28 = vadd.f32 %v188_v25, %v184_v24  ;;  %v196_v29 = vrot.slane %v195_v26, 4 }
 0x1ad   :  { %v190_v30 = vrot.slane %v189_v28, 2  ;;  %v197_v31 = vadd.f32 %v196_v29, %v195_v26 }
 0x1af   :  { %v191_v32 = vadd.f32 %v190_v30, %v189_v28  ;;  %v198_v33 = vrot.slane %v197_v31, 2 }
 0x1b1   :  { %v192_v34 = vrot.slane %v191_v32, 1  ;;  %v199_v35 = vadd.f32 %v198_v33, %v197_v31 }
 0x1b3   :  { %v193_v36 = vadd.f32 %v192_v34, %v191_v32  ;;  %v200_v37 = vrot.slane %v199_v35, 1 }
 0x1b5   :  { %v194_v38 = vmul.f32 0.125, %v193_v36  ;;  %v201_v39 = vadd.f32 %v200_v37, %v199_v35 }
 0x1b7   :  { %v202_v40 = vmul.f32 0.125, %v201_v39  ;;  %v203_v41 = vmul.f32 %v194_v38, %v194_v38 }
 0x1b9   :  { %v204_v5 = vsub.f32 %v202_v40, %v203_v41 }
 0x1bb   :  { %v207_v42 = vadd.f32 1e-05, %v204_v5 }
 0x1bd   :  { %499 = vrsqrt.f32 %v207_v42 }
 0x1c7   :  { %v500_v44 = vpop.eup %499 }
 0x1c8   :  { %v209_v45 = vmul.f32 %v500_v44, %v205_v43 }
 0x1ca   :  { %v215_v47 = vrot.slane %v209_v45, %v659_v52  ;;  %v210_v48 = vmul.f32 %v209_v45, %v194_v38 }
 0x1cc   :  { %v211_v49 = vsub.f32 %v206_v46, %v210_v48  ;;  %v216_v50 = vmul.f32 %v215_v47, %v184_v24 }
 0x1ce   :  { %v220_v51 = vrot.slane %v211_v49, %v659_v52 }
 0x1d0   :  { %v221_v53 = vadd.f32 %v220_v51, %v216_v50 }
 0x1d2   :  { %v222_v54 = vmax.f32 %v221_v53, 0.0 }
 0x1d4   :  { %437 = vmatmul.mubr.f32.vlgmr.msra.gmra.mrb[0].mxu1 %v222_v54 }
 0x2a7   :  { %v312_v56 = vpop.f32.mrb[0].mxu1 }
 0x2a8   :  { %v313_v57 = vadd.f32 %v334_v55, %v312_v56  ;;  %v438_v58 = vpop.f32.mrb[1].mxu1 }
 0x2aa   :  { %316 = vst [vmem:[#allocation7] sm:$0xff] %v313_v57 }
 0x2ab   :  { %556 = shalt.err (!%p553_p6)
}
 0x2ac   :  { %s557_s13 = scalar_lea.hbm %s702_s6, 128 }
 0x2ad   :  { %p558_p7 = scmp.ne.s32.totalorder %s702_s6, %s557_s13  ;;  %p561_p8 = scmp.lt.u32.totalorder %s557_s13, %s702_s6 }
 0x2af   :  { %p563_p9 = pnand %p561_p8, %p558_p7 }
 0x2b1   :  { %566 = shalt.err (!%p563_p9)
}
 0x2b2   :  { %326 = dma.vmem_to_hbm [thread:$0]  %s324_s10, 128, %s702_s6, [#allocation4]  }
 0x2b3   :  { %571 = dma.done.wait [#allocation4], 128  }
 0x2b4   :  { %572 = vsyncadd [#allocation4], 4294967168 }
 0x2b5   :  { %330 = vsyncpa [#allocation3], 1 }
 0x2b6   :  { %331 = vsyncpa [#allocation6], 1 }
 0x2b7   :  { %332 = vsyncpa [#allocation4], 1 }

</bundles_post_ra>
